<compile_context>
chip_gen: v7x
topology: tpu7x:2x2x1
jax: 0.10.0
libtpu: 0.0.40
codegen_flags: <defaults>
</compile_context>

<pallas_src>
import functools

import jax
import jax.numpy as jnp
from jax.experimental import pallas as pl
from jax.experimental.pallas import tpu as pltpu


# ------------------------------ Pallas kernel ------------------------------

def _patch_embed_kernel(w_ref, b_ref, x_ref, o_ref):
    # w: (O, K) bf16 (VMEM resident)   b: (O, 1) f32 (VMEM resident)
    # x: (1, K, TN) bf16 token tile    o: (1, O, TN) caller dtype
    # out = W @ patches + bias  — token dim on lanes (lane-dense stores),
    # bf16 MXU operands, f32 accumulation, bias add in f32.
    acc = jnp.dot(w_ref[...], x_ref[0], preferred_element_type=jnp.float32)
    o_ref[0] = (acc + b_ref[...]).astype(o_ref.dtype)


def patch_embed(x_nchw, weight_oipp, bias_o, patch_size, *,
                resident_in_vmem=True, tn_max=512):
    """Conv2d(C, C, kernel=patch, stride=patch, bias=True) as an im2col MXU matmul."""
    B, C, H, W = x_nchw.shape
    P = int(patch_size)
    O = weight_oipp.shape[0]
    Hp, Wp = H // P, W // P
    n_tok = Hp * Wp                       # tokens per image
    K = C * P * P                         # contraction size
    out_dtype = x_nchw.dtype
    out_isz = jnp.dtype(out_dtype).itemsize

    # im2col for a non-overlapping patch conv = free reshape + one transpose
    # pass (written in bf16 to halve its HBM bytes):
    #   (B, C, Hp, P, Wp, P) -> (B, C, P, P, Hp, Wp) -> (B, K, n_tok)
    xr = x_nchw[:, :, :Hp * P, :Wp * P].reshape(B, C, Hp, P, Wp, P)
    patches = jnp.transpose(xr, (0, 1, 3, 5, 2, 4))
    patches = patches.reshape(B, K, n_tok).astype(jnp.bfloat16)

    # Lane-dense token tiling: TN is a multiple of 128 (or the full per-image
    # token count if that is smaller, avoiding useless padding at toy sizes).
    if n_tok <= tn_max:
        TN, n_tiles, n_pad = n_tok, 1, n_tok
    else:
        TN = tn_max
        n_tiles = pl.cdiv(n_tok, TN)
        n_pad = n_tiles * TN
        if n_pad != n_tok:
            patches = jnp.pad(patches, ((0, 0), (0, 0), (0, n_pad - n_tok)))

    w2 = weight_oipp.reshape(O, K).astype(jnp.bfloat16)   # K ordered (c, ph, pw)
    b2 = bias_o.reshape(O, 1).astype(jnp.float32)

    if resident_in_vmem:
        # Whole-array VMEM residents: single buffer (index is constant across grid).
        w_spec = pl.BlockSpec(memory_space=pltpu.MemorySpace.VMEM)
        b_spec = pl.BlockSpec(memory_space=pltpu.MemorySpace.VMEM)
        n_w_buf = 1
    else:
        # Fallback: constant-index blocked specs (default double-buffered).
        w_spec = pl.BlockSpec((O, K), lambda b, n: (0, 0))
        b_spec = pl.BlockSpec((O, 1), lambda b, n: (0, 0))
        n_w_buf = 2

    # Right-sized VMEM limit: double-buffered streaming blocks + resident weight,
    # plus ~30% headroom (kept well under the v7x 64 MiB physical VMEM).
    vmem_bytes = (2 * K * TN * 2 +                 # patches blocks (bf16, x2 buffers)
                  2 * O * TN * out_isz +           # output blocks (x2 buffers)
                  n_w_buf * (O * K * 2 + O * 4))   # resident weight + bias
    vmem_limit = min(max(int(vmem_bytes * 1.3) + (2 << 20), 4 << 20), 48 << 20)

    out = pl.pallas_call(
        _patch_embed_kernel,
        out_shape=jax.ShapeDtypeStruct((B, O, n_pad), out_dtype),
        grid=(B, n_tiles),
        in_specs=[
            w_spec,                                             # weight: resident
            b_spec,                                             # bias:   resident
            pl.BlockSpec((1, K, TN), lambda b, n: (b, 0, n)),   # TN tokens / step
        ],
        out_specs=pl.BlockSpec((1, O, TN), lambda b, n: (b, 0, n)),
        compiler_params=pltpu.CompilerParams(
            dimension_semantics=("parallel", "parallel"),       # b and token tiles
            vmem_limit_bytes=vmem_limit,
        ),
        cost_estimate=pl.CostEstimate(
            flops=2 * B * n_pad * O * K,
            transcendentals=0,
            bytes_accessed=(O * K * 2 + O * 4            # bf16 weight + f32 bias (once)
                            + B * n_pad * K * 2          # bf16 patches
                            + B * n_pad * O * out_isz),  # output
        ),
    )(w2, b2, patches)

    # Drop token padding (if any); final reshape is layout-free.
    return out[:, :, :n_tok].reshape(B, O, Hp, Wp)


# ------------------------------- module glue --------------------------------

def channel_embeddings_forward(params, x, patch_size, resident_in_vmem=True):
    # Matches Channel_Embeddings.forward: returns patch_embeddings(x) only.
    # position_embeddings / dropout exist on the module but are unused in forward().
    if x is None:
        return None
    return patch_embed(x, params["patch_w"], params["patch_b"], patch_size,
                       resident_in_vmem=resident_in_vmem)


def init_params(key, in_channels, patch_size, img_size):
    kw, kb = jax.random.split(key, 2)
    P = int(patch_size)
    n_patches = (img_size // P) * (img_size // P)
    return {
        "patch_w": 0.1 * jax.random.normal(
            kw, (in_channels, in_channels, P, P), jnp.float32),   # (O, I, P, P)
        "patch_b": 0.1 * jax.random.normal(kb, (in_channels,), jnp.float32),
        # kept for parity with the PyTorch module; unused by forward():
        "pos_emb": jnp.zeros((1, n_patches, in_channels), jnp.float32),
    }


# ---------------------------------- main ------------------------------------

if __name__ == "__main__":
    key = jax.random.PRNGKey(0)
    kx, kp = jax.random.split(key, 2)

    B, C, H, W = 2, 16, 16, 16
    PATCH = 2                                   # -> 8x8 = 64 patches per image
    x = jax.random.normal(kx, (B, C, H, W), jnp.float32)
    params = init_params(kp, C, PATCH, H)

    def run(resident):
        f = jax.jit(functools.partial(channel_embeddings_forward,
                                      patch_size=PATCH,
                                      resident_in_vmem=resident))
        return jax.block_until_ready(f(params, x))

    try:
        out = run(True)
    except Exception:
        # TODO(synk): whole-array VMEM residency rejected by this JAX build;
        # retry with constant-index (double-buffered) weight/bias blocks.
        out = run(False)

    assert out.shape == (B, C, H // PATCH, W // PATCH), out.shape

    # Numerical check against XLA's strided conv (independent, true-f32 path).
    ref = jax.lax.conv_general_dilated(
        x, params["patch_w"], window_strides=(PATCH, PATCH), padding="VALID",
        dimension_numbers=("NCHW", "OIHW", "NCHW"),
        precision=jax.lax.Precision.HIGHEST,
    ) + params["patch_b"].reshape(1, C, 1, 1)
    err = jnp.max(jnp.abs(out - ref))
    # bf16 operands with f32 accumulation -> a few e-3 typical error at these scales.
    assert err < 3e-2, f"max abs err {err}"

    print("KERNEL_OK")
</pallas_src>

<mosaic_0001>
module attributes {stable_mosaic.version = 11 : i64} {
  func.func @_patch_embed_kernel(%arg0: i32, %arg1: i32, %arg2: memref<16x64xbf16, #tpu.memory_space<vmem>>, %arg3: memref<16x1xf32, #tpu.memory_space<vmem>>, %arg4: memref<1x64x64xbf16, #tpu.memory_space<vmem>>, %arg5: memref<1x16x64xf32, #tpu.memory_space<vmem>>) attributes {dimension_semantics = [#tpu.dimension_semantics<parallel>, #tpu.dimension_semantics<parallel>], iteration_bounds = array<i64: 2, 1>, scalar_prefetch = 0 : i64, scratch_operands = 0 : i64, tpu.core_type = #tpu.core_type<tc>, window_params = [{pipeline_mode = #tpu.pipeline_mode<synchronous>, transform_indices = @transform_0, window_bounds = array<i64: 16, 64>}, {pipeline_mode = #tpu.pipeline_mode<synchronous>, transform_indices = @transform_1, window_bounds = array<i64: 16, 1>}, {transform_indices = @transform_2, window_bounds = array<i64: 1, 64, 64>}, {transform_indices = @transform_3, window_bounds = array<i64: 1, 16, 64>}]} {
    %c0 = arith.constant 0 : index
    %c0_0 = arith.constant 0 : index
    %0 = vector.load %arg2[%c0, %c0_0] : memref<16x64xbf16, #tpu.memory_space<vmem>>, vector<16x64xbf16>
    %c0_1 = arith.constant 0 : index
    %c0_2 = arith.constant 0 : index
    %c0_3 = arith.constant 0 : index
    %1 = vector.load %arg4[%c0_1, %c0_2, %c0_3] : memref<1x64x64xbf16, #tpu.memory_space<vmem>>, vector<1x64x64xbf16>
    %2 = vector.shape_cast %1 : vector<1x64x64xbf16> to vector<64x64xbf16>
    %cst = arith.constant dense<0.000000e+00> : vector<16x64xf32>
    %3 = tpu.matmul %0, %2, %cst {dimension_numbers = #tpu.dot_dimension_numbers<[1], [0], [0], [1], [0, 0, 1, 1], [], []>} : vector<16x64xbf16>, vector<64x64xbf16>, vector<16x64xf32> -> vector<16x64xf32>
    %c0_4 = arith.constant 0 : index
    %c0_5 = arith.constant 0 : index
    %4 = vector.load %arg3[%c0_4, %c0_5] : memref<16x1xf32, #tpu.memory_space<vmem>>, vector<16x1xf32>
    %5 = vector.broadcast %4 : vector<16x1xf32> to vector<16x64xf32>
    %6 = arith.addf %3, %5 : vector<16x64xf32>
    %c0_6 = arith.constant 0 : index
    %c0_7 = arith.constant 0 : index
    %c0_8 = arith.constant 0 : index
    %7 = vector.load %arg5[%c0_6, %c0_7, %c0_8] : memref<1x16x64xf32, #tpu.memory_space<vmem>>, vector<1x16x64xf32>
    %8 = vector.shape_cast %7 : vector<1x16x64xf32> to vector<16x64xf32>
    %9 = vector.shape_cast %6 : vector<16x64xf32> to vector<1x16x64xf32>
    tpu.vector_store %arg5[%c0_6, %c0_7, %c0_8], %9 {strides = array<i32>} : memref<1x16x64xf32, #tpu.memory_space<vmem>>, vector<1x16x64xf32>,
    return
  }
  func.func @transform_0(%arg0: i32, %arg1: i32) -> (i32, i32) {
    %c0_i32 = arith.constant 0 : i32
    %c0_i32_0 = arith.constant 0 : i32
    %c0_i32_1 = arith.constant 0 : i32
    return %c0_i32, %c0_i32_0 : i32, i32
  }
  func.func @transform_1(%arg0: i32, %arg1: i32) -> (i32, i32) {
    %c0_i32 = arith.constant 0 : i32
    %c0_i32_0 = arith.constant 0 : i32
    %c0_i32_1 = arith.constant 0 : i32
    return %c0_i32, %c0_i32_0 : i32, i32
  }
  func.func @transform_2(%arg0: i32, %arg1: i32) -> (i32, i32, i32) {
    %c0_i32 = arith.constant 0 : i32
    %c0_i32_0 = arith.constant 0 : i32
    return %arg0, %c0_i32, %arg1 : i32, i32, i32
  }
  func.func @transform_3(%arg0: i32, %arg1: i32) -> (i32, i32, i32) {
    %c0_i32 = arith.constant 0 : i32
    %c0_i32_0 = arith.constant 0 : i32
    return %arg0, %c0_i32, %arg1 : i32, i32, i32
  }
}

module attributes {stable_mosaic.version = 11 : i64} {
  func.func @_patch_embed_kernel(%arg0: i32, %arg1: i32, %arg2: memref<16x64xbf16, #tpu.memory_space<vmem>>, %arg3: memref<16x1xf32, #tpu.memory_space<vmem>>, %arg4: memref<1x64x64xbf16, #tpu.memory_space<vmem>>, %arg5: memref<1x16x64xf32, #tpu.memory_space<vmem>>) attributes {dimension_semantics = [#tpu.dimension_semantics<parallel>, #tpu.dimension_semantics<parallel>], iteration_bounds = array<i64: 2, 1>, scalar_prefetch = 0 : i64, scratch_operands = 0 : i64, tpu.core_type = #tpu.core_type<tc>, window_params = [{pipeline_mode = #tpu.pipeline_mode<synchronous>, transform_indices = @transform_0, window_bounds = array<i64: 16, 64>}, {pipeline_mode = #tpu.pipeline_mode<synchronous>, transform_indices = @transform_1, window_bounds = array<i64: 16, 1>}, {transform_indices = @transform_2, window_bounds = array<i64: 1, 64, 64>}, {transform_indices = @transform_3, window_bounds = array<i64: 1, 16, 64>}]} {
    %c0 = arith.constant 0 : index
    %c0_0 = arith.constant 0 : index
    %0 = vector.load %arg2[%c0, %c0_0] : memref<16x64xbf16, #tpu.memory_space<vmem>>, vector<16x64xbf16>
    %c0_1 = arith.constant 0 : index
    %c0_2 = arith.constant 0 : index
    %c0_3 = arith.constant 0 : index
    %1 = vector.load %arg4[%c0_1, %c0_2, %c0_3] : memref<1x64x64xbf16, #tpu.memory_space<vmem>>, vector<1x64x64xbf16>
    %2 = vector.shape_cast %1 : vector<1x64x64xbf16> to vector<64x64xbf16>
    %cst = arith.constant dense<0.000000e+00> : vector<16x64xf32>
    %3 = tpu.matmul %0, %2, %cst {dimension_numbers = #tpu.dot_dimension_numbers<[1], [0], [0], [1], [0, 0, 1, 1], [], []>} : vector<16x64xbf16>, vector<64x64xbf16>, vector<16x64xf32> -> vector<16x64xf32>
    %c0_4 = arith.constant 0 : index
    %c0_5 = arith.constant 0 : index
    %4 = vector.load %arg3[%c0_4, %c0_5] : memref<16x1xf32, #tpu.memory_space<vmem>>, vector<16x1xf32>
    %5 = vector.broadcast %4 : vector<16x1xf32> to vector<16x64xf32>
    %6 = arith.addf %3, %5 : vector<16x64xf32>
    %c0_6 = arith.constant 0 : index
    %c0_7 = arith.constant 0 : index
    %c0_8 = arith.constant 0 : index
    %7 = vector.load %arg5[%c0_6, %c0_7, %c0_8] : memref<1x16x64xf32, #tpu.memory_space<vmem>>, vector<1x16x64xf32>
    %8 = vector.shape_cast %7 : vector<1x16x64xf32> to vector<16x64xf32>
    %9 = vector.shape_cast %6 : vector<16x64xf32> to vector<1x16x64xf32>
    tpu.vector_store %arg5[%c0_6, %c0_7, %c0_8], %9 {strides = array<i32>} : memref<1x16x64xf32, #tpu.memory_space<vmem>>, vector<1x16x64xf32>,
    return
  }
  func.func @transform_0(%arg0: i32, %arg1: i32) -> (i32, i32) {
    %c0_i32 = arith.constant 0 : i32
    %c0_i32_0 = arith.constant 0 : i32
    %c0_i32_1 = arith.constant 0 : i32
    return %c0_i32, %c0_i32_0 : i32, i32
  }
  func.func @transform_1(%arg0: i32, %arg1: i32) -> (i32, i32) {
    %c0_i32 = arith.constant 0 : i32
    %c0_i32_0 = arith.constant 0 : i32
    %c0_i32_1 = arith.constant 0 : i32
    return %c0_i32, %c0_i32_0 : i32, i32
  }
  func.func @transform_2(%arg0: i32, %arg1: i32) -> (i32, i32, i32) {
    %c0_i32 = arith.constant 0 : i32
    %c0_i32_0 = arith.constant 0 : i32
    return %arg0, %c0_i32, %arg1 : i32, i32, i32
  }
  func.func @transform_3(%arg0: i32, %arg1: i32) -> (i32, i32, i32) {
    %c0_i32 = arith.constant 0 : i32
    %c0_i32_0 = arith.constant 0 : i32
    return %arg0, %c0_i32, %arg1 : i32, i32, i32
  }
}

</mosaic_0001>

<bundles_post_ra>
// kernel: channel_embeddings_forward.1
= control target key start
LH: loop header
LB: loop body
LE: loop exit
PB: predicated region body
PF: predicated region fallthrough
CT: control target
= control target key end

     0   :  { %s500_s12 = smov 0   ;;  %s502_s13 = smov 0   ;;  %s542_s0 = inlined_call_operand.vmem [shape: bf16[16,64], index: 0, kind: input, shape index: {}]   ;;  %s543_s1 = inlined_call_operand.vmem [shape: f32[16,1], index: 1, kind: input, shape index: {}]   ;;  %s544_s2 = inlined_call_operand.vmem [shape: bf16[2,64,64], index: 2, kind: input, shape index: {}]   ;;  %s545_s3 = inlined_call_operand.vmem [shape: f32[2,16,64], index: 3, kind: output, shape index: {}]  }
   0x1   :  { %s504_s14 = smov 0  }
   0x2 LB: > { %s25_s15 = sadd.s32 1, %s471_s13  ;;  %p388_p0 = scmp.ge.s32.totalorder %s475_s14, 1  ;;  %s475_s14 = sphi %s504_s14, %s13_s14   ;;  %s471_s13 = sphi %s502_s13, %s547_s13   ;;  %s467_s12 = sphi %s500_s12, %s546_s12  }
   0x3   : > { %p27_p1 = scmp.ge.s32.totalorder %s25_s15, 2  ;;  %p156_p2 = scmp.lt.s32.totalorder %s475_s14, 3 }
   0x5   : > { %s549_s15 = smov (%p27_p1, %s25_s15), 0  ;;  %p157_p3 = pnand %p388_p0, %p156_p2 }
   0x6   : > { %p186_p4 = scmp.lt.s32.totalorder (!%p157_p3), %s467_s12, 1  ;;  %v477_v0 = vmov (!%p157_p3), 0.0   ;;  %vm478_vm0 = vmmov (!%p157_p3), 0   ;;  %v213_v1 = vld [vmem:[%s543_s1] sm:$0xff] (!%p157_p3)  ;;  %v479_v2 = vmov (!%p157_p3), 0   ;;  %v214_v3 = vld [vmem:[%s543_s1 + $0x8] sm:$0xff] (!%p157_p3) }
   0x7   : > { %160 = sbr.rel (%p157_p3) target bundleno = 250 (0xfa), region = 32  ;;  %408 = vmatprep.subr.bf16.mxu0 (!%p157_p3), %v477_v0  ;;  %416 = vmatprep.mubr.msk.bf16.mxu0 (!%p157_p3), %vm478_vm0, %v477_v0  ;;  %v452_v8 = vld [vmem:[%s542_s0] sm:$0xff] (!%p157_p3)   ;;  %vm254_vm1 = vcmask (!%p157_p3), 523264  }
   0x8   : > { %447 = vset.pattern.permute.xlu0 (!%p157_p3), %v479_v2 }
   0x9   : > { %217 = vperm.xlu0 (!%p157_p3), %447, %v213_v1  }
   0xd   : > { %222 = vperm.xlu0 (!%p157_p3), %447, %v214_v3  }
   0xe   : > { %s551_s12 = smov (!%p186_p4, %s467_s12), 1 }
   0xf   : > { %s401_s18 = sshll.u32 %s551_s12, 5  ;;  %s402_s26 = sshll.u32 %s551_s12, 4 }
  0x10   : > { %s193_s23 = scalar_lea.vmem %s544_s2, %s401_s18  ;;  %s201_s29 = scalar_lea.vmem %s545_s3, %s402_s26 }
  0x11   : > { %v448_v4 = vld [vmem:[%s193_s23] sm:$0xff]   ;;  %v449_v5 = vld [vmem:[%s193_s23 + $0x8] sm:$0xff]   ;;  %v450_v6 = vld [vmem:[%s193_s23 + $0x10] sm:$0xff]  }
  0x12   : > { %409 = vmatpush3.bf16.msra.mxu0 %v448_v4  ;;  %v451_v7 = vld [vmem:[%s193_s23 + $0x18] sm:$0xff]  }
  0x13   : > { %410 = vmatprep.subr.bf16.mxu0 %v477_v0 }
  0x16   : > { %411 = vmatpush3.bf16.msra.mxu0 %v449_v5 }
  0x17   : > { %412 = vmatprep.subr.bf16.mxu0 %v477_v0 }
  0x1a   : > { %413 = vmatpush3.bf16.msra.mxu0 %v450_v6 }
  0x1b   : > { %414 = vmatprep.subr.bf16.mxu0 %v477_v0 }
  0x1e   : > { %415 = vmatpush3.bf16.msra.mxu0 %v451_v7 }
  0x21   : > { %417 = vmatmul.mubr.msk.bf16.vlgmr.msra.gmra.mrb[0].mxu0 %vm254_vm1, %v452_v8 }
  0x88   : > { %v218_v9 = vpop.permute.xlu0 %217 }
  0x8c   : > { %v223_v13 = vpop.permute.xlu0 %222 }
  0xf4   : > { %v292_v10 = vpop.f32.mrb[0].mxu0 }
  0xf5   : > { %v293_v11 = vadd.f32 %v292_v10, %v218_v9  ;;  %v418_v12 = vpop.f32.mrb[1].mxu0 }
  0xf6   : > { %v295_v14 = vpop.f32.mrb[2].mxu0 }
  0xf7   : > { %299 = vst.msk [vmem:[%s201_s29] sm:$0xff] %vm254_vm1, %v293_v11  ;;  %v296_v15 = vadd.f32 %v295_v14, %v223_v13  ;;  %v419_v16 = vpop.f32.mrb[3].mxu0 }
  0xf9   : > { %300 = vst.msk [vmem:[%s201_s29 + $0x8] sm:$0xff] %vm254_vm1, %v296_v15 }
  0xfa PF: > { %s13_s14 = sadd.s32 1, %s475_s14   ;;  %s546_s12 = smov %s471_s13 }
  0xfb   : > { %p10_p5 = scmp.ge.s32.totalorder %s13_s14, 4   ;;  %s547_s13 = smov %s549_s15 }
  0xfd   :  { %12 = sbr.rel (!%p10_p5) target bundleno = 2 (0x2), region = 62 }

// kernel: channel_embeddings_forward.1
= control target key start
LH: loop header
LB: loop body
LE: loop exit
PB: predicated region body
PF: predicated region fallthrough
CT: control target
= control target key end

     0   :  { %s500_s12 = smov 0   ;;  %s502_s13 = smov 0   ;;  %s542_s0 = inlined_call_operand.vmem [shape: bf16[16,64], index: 0, kind: input, shape index: {}]   ;;  %s543_s1 = inlined_call_operand.vmem [shape: f32[16,1], index: 1, kind: input, shape index: {}]   ;;  %s544_s2 = inlined_call_operand.vmem [shape: bf16[2,64,64], index: 2, kind: input, shape index: {}]   ;;  %s545_s3 = inlined_call_operand.vmem [shape: f32[2,16,64], index: 3, kind: output, shape index: {}]  }
   0x1   :  { %s504_s14 = smov 0  }
   0x2 LB: > { %s25_s15 = sadd.s32 1, %s471_s13  ;;  %p388_p0 = scmp.ge.s32.totalorder %s475_s14, 1  ;;  %s475_s14 = sphi %s504_s14, %s13_s14   ;;  %s471_s13 = sphi %s502_s13, %s547_s13   ;;  %s467_s12 = sphi %s500_s12, %s546_s12  }
   0x3   : > { %p27_p1 = scmp.ge.s32.totalorder %s25_s15, 2  ;;  %p156_p2 = scmp.lt.s32.totalorder %s475_s14, 3 }
   0x5   : > { %s549_s15 = smov (%p27_p1, %s25_s15), 0  ;;  %p157_p3 = pnand %p388_p0, %p156_p2 }
   0x6   : > { %p186_p4 = scmp.lt.s32.totalorder (!%p157_p3), %s467_s12, 1  ;;  %v477_v0 = vmov (!%p157_p3), 0.0   ;;  %vm478_vm0 = vmmov (!%p157_p3), 0   ;;  %v213_v1 = vld [vmem:[%s543_s1] sm:$0xff] (!%p157_p3)  ;;  %v479_v2 = vmov (!%p157_p3), 0   ;;  %v214_v3 = vld [vmem:[%s543_s1 + $0x8] sm:$0xff] (!%p157_p3) }
   0x7   : > { %160 = sbr.rel (%p157_p3) target bundleno = 250 (0xfa), region = 32  ;;  %408 = vmatprep.subr.bf16.mxu0 (!%p157_p3), %v477_v0  ;;  %416 = vmatprep.mubr.msk.bf16.mxu0 (!%p157_p3), %vm478_vm0, %v477_v0  ;;  %v452_v8 = vld [vmem:[%s542_s0] sm:$0xff] (!%p157_p3)   ;;  %vm254_vm1 = vcmask (!%p157_p3), 523264  }
   0x8   : > { %447 = vset.pattern.permute.xlu0 (!%p157_p3), %v479_v2 }
   0x9   : > { %217 = vperm.xlu0 (!%p157_p3), %447, %v213_v1  }
   0xd   : > { %222 = vperm.xlu0 (!%p157_p3), %447, %v214_v3  }
   0xe   : > { %s551_s12 = smov (!%p186_p4, %s467_s12), 1 }
   0xf   : > { %s401_s18 = sshll.u32 %s551_s12, 5  ;;  %s402_s26 = sshll.u32 %s551_s12, 4 }
  0x10   : > { %s193_s23 = scalar_lea.vmem %s544_s2, %s401_s18  ;;  %s201_s29 = scalar_lea.vmem %s545_s3, %s402_s26 }
  0x11   : > { %v448_v4 = vld [vmem:[%s193_s23] sm:$0xff]   ;;  %v449_v5 = vld [vmem:[%s193_s23 + $0x8] sm:$0xff]   ;;  %v450_v6 = vld [vmem:[%s193_s23 + $0x10] sm:$0xff]  }
  0x12   : > { %409 = vmatpush3.bf16.msra.mxu0 %v448_v4  ;;  %v451_v7 = vld [vmem:[%s193_s23 + $0x18] sm:$0xff]  }
  0x13   : > { %410 = vmatprep.subr.bf16.mxu0 %v477_v0 }
  0x16   : > { %411 = vmatpush3.bf16.msra.mxu0 %v449_v5 }
  0x17   : > { %412 = vmatprep.subr.bf16.mxu0 %v477_v0 }
  0x1a   : > { %413 = vmatpush3.bf16.msra.mxu0 %v450_v6 }
  0x1b   : > { %414 = vmatprep.subr.bf16.mxu0 %v477_v0 }
  0x1e   : > { %415 = vmatpush3.bf16.msra.mxu0 %v451_v7 }
  0x21   : > { %417 = vmatmul.mubr.msk.bf16.vlgmr.msra.gmra.mrb[0].mxu0 %vm254_vm1, %v452_v8 }
  0x88   : > { %v218_v9 = vpop.permute.xlu0 %217 }
  0x8c   : > { %v223_v13 = vpop.permute.xlu0 %222 }
  0xf4   : > { %v292_v10 = vpop.f32.mrb[0].mxu0 }
  0xf5   : > { %v293_v11 = vadd.f32 %v292_v10, %v218_v9  ;;  %v418_v12 = vpop.f32.mrb[1].mxu0 }
  0xf6   : > { %v295_v14 = vpop.f32.mrb[2].mxu0 }
  0xf7   : > { %299 = vst.msk [vmem:[%s201_s29] sm:$0xff] %vm254_vm1, %v293_v11  ;;  %v296_v15 = vadd.f32 %v295_v14, %v223_v13  ;;  %v419_v16 = vpop.f32.mrb[3].mxu0 }
  0xf9   : > { %300 = vst.msk [vmem:[%s201_s29 + $0x8] sm:$0xff] %vm254_vm1, %v296_v15 }
  0xfa PF: > { %s13_s14 = sadd.s32 1, %s475_s14   ;;  %s546_s12 = smov %s471_s13 }
  0xfb   : > { %p10_p5 = scmp.ge.s32.totalorder %s13_s14, 4   ;;  %s547_s13 = smov %s549_s15 }
  0xfd   :  { %12 = sbr.rel (!%p10_p5) target bundleno = 2 (0x2), region = 62 }

</bundles_post_ra>
